<compile_context>
chip_gen: v6e
topology: v6e:2x2x1
jax: 0.10.0
libtpu: 0.0.40
codegen_flags: <defaults>
</compile_context>

<pallas_src>
import functools

import jax
import jax.numpy as jnp
from jax.experimental import pallas as pl
from jax.experimental.pallas import tpu as pltpu


# ---------------------------------------------------------------------------
# Activation quantization (one-shot, memory-bound elementwise kernel)
# ---------------------------------------------------------------------------
def _quant_kernel(scale_ref, x_ref, o_ref, *, num_bits):
    """Applies clamp -> affine -> round -> dequant using exact global stats
    (precomputed in SMEM) and stores the quantized activations as bf16."""
    x = x_ref[...].astype(jnp.float32)
    min_val = scale_ref[0]
    max_val = scale_ref[1]
    beta = scale_ref[2]
    alpha_eps = scale_ref[3]           # (alpha + 1e-8)
    inv_alpha = scale_ref[4]           # 1 / (alpha + 1e-8)
    s = float(2 ** num_bits - 1)
    inv_s = 1.0 / s
    # jnp.where (not min/max) to match torch.where semantics of the reference.
    x_ = jnp.where(x > min_val, x, min_val)
    x_ = jnp.where(x_ < max_val, x_, max_val)
    x_ = (x_ - beta) * inv_alpha
    x_ = jnp.round(x_ * s) * inv_s     # round-half-to-even == torch.round
    o_ref[...] = (x_ * alpha_eps + beta).astype(o_ref.dtype)


def quantize_activation_bf16(x, num_bits):
    """Exact global stats (plain-JAX reduction) + Pallas elementwise quant.
    Returns x_int as bf16, ready for the MXU GEMM."""
    xf = x.astype(jnp.float32)
    n = xf.size
    mean = jnp.sum(xf) / n
    var = jnp.sum((xf - mean) ** 2) / (n - 1)      # torch.std (unbiased)
    std = jnp.sqrt(var)
    min_val = mean - 2.0 * std
    max_val = mean + 2.0 * std
    alpha_eps = (max_val - min_val) + 1e-8
    beta = min_val
    inv_alpha = 1.0 / alpha_eps
    scale = jnp.stack([min_val, max_val, beta, alpha_eps,
                       inv_alpha]).astype(jnp.float32)

    B, F = xf.shape
    tm = _pick_tile(B, 512, 8)
    tk = _pick_tile(F, 1024, 128)
    grid = (B // tm, F // tk)

    return pl.pallas_call(
        functools.partial(_quant_kernel, num_bits=num_bits),
        out_shape=jax.ShapeDtypeStruct((B, F), jnp.bfloat16),
        grid=grid,
        in_specs=[pl.BlockSpec(memory_space=pltpu.MemorySpace.SMEM),
                  pl.BlockSpec((tm, tk), lambda i, j: (i, j))],
        out_specs=pl.BlockSpec((tm, tk), lambda i, j: (i, j)),
        compiler_params=pltpu.CompilerParams(
            dimension_semantics=("parallel", "parallel")),
    )(scale, xf)


# ---------------------------------------------------------------------------
# Tiled GEMM (+ bias) kernel
# ---------------------------------------------------------------------------
def _gemm_kernel(*refs, has_bias):
    if has_bias:
        x_ref, w_ref, b_ref, o_ref, acc_ref = refs
    else:
        x_ref, w_ref, o_ref, acc_ref = refs

    k = pl.program_id(2)

    @pl.when(k == 0)
    def _():
        acc_ref[...] = jnp.zeros_like(acc_ref)

    # Hot path: bf16 MXU matmul with f32 accumulation.
    acc_ref[...] += jnp.dot(x_ref[...], w_ref[...],
                            preferred_element_type=jnp.float32)

    @pl.when(k == pl.num_programs(2) - 1)
    def _():
        out = acc_ref[...]
        if has_bias:
            out = out + b_ref[...]            # (1, tn) f32, broadcasts
        o_ref[...] = out.astype(o_ref.dtype)


# ---------------------------------------------------------------------------
# Tile selection helpers
# ---------------------------------------------------------------------------
def _pick_tile(dim, pref, base):
    """Largest multiple of `base` that divides `dim` and is <= pref.
    Only falls back to the full dimension if no such divisor exists
    (i.e. `dim` is not a multiple of `base`) — no surprise huge blocks."""
    t = (min(pref, dim) // base) * base
    while t >= base:
        if dim % t == 0:
            return t
        t -= base
    return dim


def _maybe_split_for_megacore(dim, tile, base):
    """If a parallel grid axis would have only one block, split it in two
    (when legal) so both TensorCores of a v7x megacore part get work."""
    if dim // tile <= 1 and dim % 2 == 0 and (dim // 2) % base == 0:
        return dim // 2
    return tile


def prepare_quant_weight(quant_weight):
    """One-time 'load time' prep: transpose to (in, out) and cast to bf16."""
    return jnp.asarray(quant_weight).T.astype(jnp.bfloat16)


# ---------------------------------------------------------------------------
# Forward wrapper
# ---------------------------------------------------------------------------
def linear_quant_lora_forward(x, w_t_bf16, bias=None, *,
                              num_bits=4, quant_act=False,
                              tm=256, tn=256, tk=512):
    """x: (B, in_feature) f32; w_t_bf16: (in_feature, out_feature) bf16
    (pre-transposed weight, see prepare_quant_weight); bias: (out_feature,)."""
    B, fin = x.shape
    fin_w, fout = w_t_bf16.shape
    assert fin == fin_w
    has_bias = bias is not None

    # Activation path: quantize once (mem-bound elementwise kernel) OR just
    # pre-cast to bf16 — either way the GEMM streams bf16 x.
    if quant_act:
        x_in = quantize_activation_bf16(x, num_bits)
    else:
        x_in = x.astype(jnp.bfloat16)

    tm = _pick_tile(B, tm, 8)
    tn = _pick_tile(fout, tn, 128)
    tk = _pick_tile(fin, tk, 128)
    tm = _maybe_split_for_megacore(B, tm, 8)
    tn = _maybe_split_for_megacore(fout, tn, 128)
    grid = (B // tm, fout // tn, fin // tk)

    in_specs = [
        pl.BlockSpec((tm, tk), lambda i, j, k: (i, k)),   # x tile (bf16)
        pl.BlockSpec((tk, tn), lambda i, j, k: (k, j)),   # W^T tile (bf16)
    ]
    args = [x_in, w_t_bf16]
    if has_bias:
        in_specs.append(pl.BlockSpec((1, tn), lambda i, j, k: (0, j)))
        args.append(jnp.asarray(bias).reshape(1, fout).astype(jnp.float32))

    out_bytes = jnp.dtype(x.dtype).itemsize
    # Double-buffered streams + f32 accumulator; explicit limit keeps
    # double-buffering intact and stays within v7x's 64 MiB physical VMEM.
    needed = (2 * (tm * tk * 2 + tk * tn * 2 + tm * tn * out_bytes
                   + (tn * 4 if has_bias else 0))
              + tm * tn * 4)
    vmem_limit = min(max(needed + (2 << 20), 32 << 20), 64 << 20)

    cost = pl.CostEstimate(
        flops=2 * B * fin * fout,
        transcendentals=0,
        bytes_accessed=(B * fin * 2 + fin * fout * 2 + B * fout * out_bytes
                        + (fout * 4 if has_bias else 0)))

    return pl.pallas_call(
        functools.partial(_gemm_kernel, has_bias=has_bias),
        out_shape=jax.ShapeDtypeStruct((B, fout), x.dtype),
        grid=grid,
        in_specs=in_specs,
        out_specs=pl.BlockSpec((tm, tn), lambda i, j, k: (i, j)),
        scratch_shapes=[pltpu.VMEM((tm, tn), jnp.float32)],
        compiler_params=pltpu.CompilerParams(
            dimension_semantics=("parallel", "parallel", "arbitrary"),
            vmem_limit_bytes=vmem_limit),
        cost_estimate=cost,
    )(*args)


# ---------------------------------------------------------------------------
# Pure-JAX reference (mirrors the PyTorch module)
# ---------------------------------------------------------------------------
def _reference_forward(x, quant_weight, bias, *, num_bits, quant_act,
                       matmul_dtype=jnp.float32):
    x = x.astype(jnp.float32)
    if quant_act:
        n = x.size
        mean = jnp.sum(x) / n
        std = jnp.sqrt(jnp.sum((x - mean) ** 2) / (n - 1))
        min_val, max_val = mean - 2 * std, mean + 2 * std
        x_ = jnp.where(x > min_val, x, min_val)
        x_ = jnp.where(x_ < max_val, x_, max_val)
        alpha, beta = max_val - min_val, min_val
        x_ = (x_ - beta) / (alpha + 1e-8)
        s = 2 ** num_bits - 1
        x_ = jnp.round(x_ * s) / s
        x_in = x_ * (alpha + 1e-8) + beta
    else:
        x_in = x
    hx = jnp.dot(x_in.astype(matmul_dtype), quant_weight.T.astype(matmul_dtype),
                 preferred_element_type=jnp.float32)
    return hx + bias if bias is not None else hx


if __name__ == "__main__":
    # Linear-layer-style shapes, sized so the tiled (M, N, K) grid, the
    # K-axis accumulator and the megacore split all get exercised.
    batch, in_feature, out_feature = 256, 512, 512
    reduced_rank, num_bits = 16, 4

    key = jax.random.PRNGKey(0)
    kx, kq, kl, kr, kb = jax.random.split(key, 5)
    x = jax.random.normal(kx, (batch, in_feature), dtype=jnp.float32)
    quant_weight = jax.random.normal(kq, (out_feature, in_feature), jnp.float32) * 0.05
    # LoRA factors exist in the module but are unused by forward(); created for parity.
    left_weight = jax.random.normal(kl, (out_feature, reduced_rank), jnp.float32) * 0.05
    right_weight = jax.random.normal(kr, (reduced_rank, in_feature), jnp.float32) * 0.05
    bias = jax.random.normal(kb, (out_feature,), jnp.float32) * 0.01

    # One-time weight prep (transpose + bf16 cast), done at "load time".
    w_t_bf16 = prepare_quant_weight(quant_weight)

    ok = True
    tile_configs = [dict(), dict(tm=64, tn=256, tk=256)]   # defaults + K-tiled grid
    for quant_act in (False, True):
        for tiles in tile_configs:
            y = linear_quant_lora_forward(
                x, w_t_bf16, bias, num_bits=num_bits, quant_act=quant_act, **tiles)
            y = jax.block_until_ready(y)

            # Tight check vs. a precision-matched (bf16 MXU) reference.
            y_bf16_ref = _reference_forward(
                x, quant_weight, bias, num_bits=num_bits, quant_act=quant_act,
                matmul_dtype=jnp.bfloat16)
            # Loose check vs. the exact f32 PyTorch-equivalent reference.
            y_f32_ref = _reference_forward(
                x, quant_weight, bias, num_bits=num_bits, quant_act=quant_act,
                matmul_dtype=jnp.float32)

            err_bf16 = float(jnp.max(jnp.abs(y - y_bf16_ref)))
            err_f32 = float(jnp.max(jnp.abs(y - y_f32_ref)))
            if not jnp.allclose(y, y_bf16_ref, atol=2e-3, rtol=2e-3):
                ok = False
                print(f"MISMATCH vs bf16-matched ref "
                      f"(quant_act={quant_act}, tiles={tiles}): {err_bf16}")
            if not jnp.allclose(y, y_f32_ref, atol=5e-2, rtol=5e-2):
                ok = False
                print(f"MISMATCH vs f32 ref "
                      f"(quant_act={quant_act}, tiles={tiles}): {err_f32}")

    if ok:
        print("KERNEL_OK")
</pallas_src>

<mosaic_0001>
module attributes {stable_mosaic.version = 11 : i64} {
  func.func @_gemm_kernel(%arg0: i32, %arg1: i32, %arg2: i32, %arg3: memref<128x512xbf16, #tpu.memory_space<vmem>>, %arg4: memref<512x256xbf16, #tpu.memory_space<vmem>>, %arg5: memref<1x256xf32, #tpu.memory_space<vmem>>, %arg6: memref<128x256xf32, #tpu.memory_space<vmem>>, %arg7: memref<128x256xf32, #tpu.memory_space<vmem>>) attributes {dimension_semantics = [#tpu.dimension_semantics<parallel>, #tpu.dimension_semantics<parallel>, #tpu.dimension_semantics<arbitrary>], iteration_bounds = array<i64: 2, 2, 1>, scalar_prefetch = 0 : i64, scratch_operands = 1 : i64, tpu.core_type = #tpu.core_type<tc>, window_params = [{transform_indices = @transform_0, window_bounds = array<i64: 128, 512>}, {transform_indices = @transform_1, window_bounds = array<i64: 512, 256>}, {transform_indices = @transform_2, window_bounds = array<i64: 1, 256>}, {transform_indices = @transform_3, window_bounds = array<i64: 128, 256>}]} {
    %c0_i32 = arith.constant 0 : i32
    %0 = arith.cmpi eq, %arg2, %c0_i32 : i32
    %1 = arith.extui %0 : i1 to i32
    %c0_i32_0 = arith.constant 0 : i32
    %2 = arith.cmpi ne, %1, %c0_i32_0 : i32
    scf.if %2 {
      %cst_10 = arith.constant 0.000000e+00 : f32
      %12 = vector.broadcast %cst_10 : f32 to vector<128x256xf32>
      %c0_11 = arith.constant 0 : index
      %c0_12 = arith.constant 0 : index
      %13 = vector.load %arg7[%c0_11, %c0_12] : memref<128x256xf32, #tpu.memory_space<vmem>>, vector<128x256xf32>
      tpu.vector_store %arg7[%c0_11, %c0_12], %12 {strides = array<i32>} : memref<128x256xf32, #tpu.memory_space<vmem>>, vector<128x256xf32>,
    } else {
    }
    %c0 = arith.constant 0 : index
    %c0_1 = arith.constant 0 : index
    %3 = vector.load %arg7[%c0, %c0_1] : memref<128x256xf32, #tpu.memory_space<vmem>>, vector<128x256xf32>
    %c0_2 = arith.constant 0 : index
    %c0_3 = arith.constant 0 : index
    %4 = vector.load %arg3[%c0_2, %c0_3] : memref<128x512xbf16, #tpu.memory_space<vmem>>, vector<128x512xbf16>
    %c0_4 = arith.constant 0 : index
    %c0_5 = arith.constant 0 : index
    %5 = vector.load %arg4[%c0_4, %c0_5] : memref<512x256xbf16, #tpu.memory_space<vmem>>, vector<512x256xbf16>
    %cst = arith.constant dense<0.000000e+00> : vector<128x256xf32>
    %6 = tpu.matmul %4, %5, %cst {dimension_numbers = #tpu.dot_dimension_numbers<[1], [0], [0], [1], [0, 0, 1, 1], [], []>} : vector<128x512xbf16>, vector<512x256xbf16>, vector<128x256xf32> -> vector<128x256xf32>
    %7 = arith.addf %3, %6 : vector<128x256xf32>
    %c0_6 = arith.constant 0 : index
    %c0_7 = arith.constant 0 : index
    %8 = vector.load %arg7[%c0_6, %c0_7] : memref<128x256xf32, #tpu.memory_space<vmem>>, vector<128x256xf32>
    tpu.vector_store %arg7[%c0_6, %c0_7], %7 {strides = array<i32>} : memref<128x256xf32, #tpu.memory_space<vmem>>, vector<128x256xf32>,
    %c0_i32_8 = arith.constant 0 : i32
    %9 = arith.cmpi eq, %arg2, %c0_i32_8 : i32
    %10 = arith.extui %9 : i1 to i32
    %c0_i32_9 = arith.constant 0 : i32
    %11 = arith.cmpi ne, %10, %c0_i32_9 : i32
    scf.if %11 {
      %c0_10 = arith.constant 0 : index
      %c0_11 = arith.constant 0 : index
      %12 = vector.load %arg7[%c0_10, %c0_11] : memref<128x256xf32, #tpu.memory_space<vmem>>, vector<128x256xf32>
      %c0_12 = arith.constant 0 : index
      %c0_13 = arith.constant 0 : index
      %13 = vector.load %arg5[%c0_12, %c0_13] : memref<1x256xf32, #tpu.memory_space<vmem>>, vector<1x256xf32>
      %14 = vector.broadcast %13 : vector<1x256xf32> to vector<128x256xf32>
      %15 = arith.addf %12, %14 : vector<128x256xf32>
      %c0_14 = arith.constant 0 : index
      %c0_15 = arith.constant 0 : index
      %16 = vector.load %arg6[%c0_14, %c0_15] : memref<128x256xf32, #tpu.memory_space<vmem>>, vector<128x256xf32>
      tpu.vector_store %arg6[%c0_14, %c0_15], %15 {strides = array<i32>} : memref<128x256xf32, #tpu.memory_space<vmem>>, vector<128x256xf32>,
    } else {
    }
    return
  }
  func.func @transform_0(%arg0: i32, %arg1: i32, %arg2: i32) -> (i32, i32) {
    %c0_i32 = arith.constant 0 : i32
    return %arg0, %arg2 : i32, i32
  }
  func.func @transform_1(%arg0: i32, %arg1: i32, %arg2: i32) -> (i32, i32) {
    %c0_i32 = arith.constant 0 : i32
    return %arg2, %arg1 : i32, i32
  }
  func.func @transform_2(%arg0: i32, %arg1: i32, %arg2: i32) -> (i32, i32) {
    %c0_i32 = arith.constant 0 : i32
    %c0_i32_0 = arith.constant 0 : i32
    return %c0_i32, %arg1 : i32, i32
  }
  func.func @transform_3(%arg0: i32, %arg1: i32, %arg2: i32) -> (i32, i32) {
    %c0_i32 = arith.constant 0 : i32
    return %arg0, %arg1 : i32, i32
  }
}

</mosaic_0001>

<bundles_post_ra>
// kernel: tpu_custom_call.1
= control target key start
LH: loop header
LB: loop body
LE: loop exit
PB: predicated region body
PF: predicated region fallthrough
CT: control target
= control target key end

     0   :  { %s2677_s0 = inlined_call_operand.hbm [shape: bf16[256,512], index: 0, kind: input, shape index: {}]   ;;  %s2678_s1 = inlined_call_operand.hbm [shape: bf16[512,512], index: 1, kind: input, shape index: {}]   ;;  %s2679_s2 = inlined_call_operand.hbm [shape: f32[1,512], index: 2, kind: input, shape index: {}]   ;;  %s2680_s3 = inlined_call_operand.hbm [shape: f32[256,512], index: 3, kind: output, shape index: {}]  }
   0x1   :  { %2692 = sst [smem:[#allocation25_spill]] %s2677_s0 }
   0x2   :  { %2693 = sst [smem:[#allocation26_spill]] %s2678_s1 }
   0x3   :  { %2694 = sst [smem:[#allocation27_spill]] %s2680_s3 }
   0x4   :  { %8 = vsyncpa [#allocation4], 0 }
   0x5   :  { %10 = vsyncpa [#allocation4 + $0x1], 0 }
   0x6   :  { %11 = vsyncpa [#allocation7], 0 }
   0x7   :  { %13 = vsyncpa [#allocation7 + $0x1], 0 }
   0x8   :  { %14 = vsyncpa [#allocation5], 0 }
   0x9   :  { %16 = vsyncpa [#allocation5 + $0x1], 0  ;;  %s2182_s12 = smov 0   ;;  %s2184_s13 = smov 0  }
   0xa   :  { %s2186_s14 = smov 0   ;;  %s2188_s15 = smov 0  }
   0xb   :  { %s2190_s16 = smov 0   ;;  %s2192_s17 = smov 0  }
   0xc   :  { %s2194_s18 = smov 0   ;;  %s2196_s19 = smov 0  }
   0xd   :  { %s2198_s20 = smov 0   ;;  %s2200_s21 = smov 0  }
   0xe   :  { %s2202_s22 = smov 0   ;;  %s2204_s23 = smov 0  }
   0xf   :  { %s2206_s24 = smov 0   ;;  %s2208_s25 = smov 0  }
  0x10 LB: > { %2695 = sst [smem:[#allocation13_spill]] %s2097_s12  ;;  %s37_s26 = sadd.s32 1, %s2141_s23  ;;  %s2149_s25 = sphi %s2208_s25, %s22_s25   ;;  %s2145_s24 = sphi %s2206_s24, %s2736_s24   ;;  %s2141_s23 = sphi %s2204_s23, %s2735_s23   ;;  %s2137_s22 = sphi %s2202_s22, %s2734_s22   ;;  %s2133_s21 = sphi %s2200_s21, %s2745_s21   ;;  %s2129_s20 = sphi %s2198_s20, %s2732_s20   ;;  %s2125_s19 = sphi %s2196_s19, %s2744_s19   ;;  %s2121_s18 = sphi %s2194_s18, %s2743_s18   ;;  %s2117_s17 = sphi %s2192_s17, %s2742_s17   ;;  %s2113_s16 = sphi %s2190_s16, %s2741_s16   ;;  %s2109_s15 = sphi %s2188_s15, %s2740_s15   ;;  %s2105_s14 = sphi %s2186_s14, %s2729_s14   ;;  %s2101_s13 = sphi %s2184_s13, %s2739_s13   ;;  %s2097_s12 = sphi %s2182_s12, %s2738_s12  }
  0x11   : > { %2696 = sst [smem:[#allocation14_spill]] %s2105_s14  ;;  %p58_p0 = scmp.eq.s32.totalorder %s2149_s25, 0 }
  0x12   : > { %2697 = sst [smem:[#allocation15_spill]] %s2129_s20  ;;  %p2256_p1 = scmp.ge.s32.totalorder %s37_s26, 2 }
  0x13   : > { %2698 = sst [smem:[#allocation16_spill]] %s2133_s21  ;;  %p85_p2 = scmp.ne.s32.totalorder %s2117_s17, %s2113_s16 }
  0x14   : > { %2699 = sst [smem:[#allocation17_spill]] %s2137_s22  ;;  %p91_p3 = scmp.ne.s32.totalorder %s2113_s16, %s2109_s15 }
  0x15   : > { %2700 = sst [smem:[#allocation18_spill]] %s2141_s23  ;;  %p1652_p4 = scmp.lt.s32.totalorder %s2149_s25, 4 }
  0x16   : > { %2701 = sst [smem:[#allocation19_spill]] %s2145_s24  ;;  %p87_p5 = por %p85_p2, %p58_p0 }
  0x17   : > { %s193_s29 = sand.u32 1, %s2149_s25   ;;  %s2681_s30 = sand.u32 1, %s2117_s17  }
  0x18   : > { %s1511_s4 = sshll.u32 %s2681_s30, 9  ;;  %s1627_s5 = sshll.u32 %s2141_s23, 7 }
  0x19   : > { %s2703_s1 = sld [smem:[#allocation26_spill]]  ;;  %s197_s9 = scalar_lea.vmem [#allocation6], %s1511_s4 }
  0x1a   : > { %s207_s10 = sshll.u32 %s197_s9, 4  ;;  %p2278_p6 = pnand %p1652_p4, %p87_p5  ;;  %s208_s10 = int_to_ptr.vmem [resolvable:$true] %s207_s10 }
  0x1b   : > { %p1517_p7 = scmp.ge.s32.totalorder %s2149_s25, 1  ;;  %s2283_s28 = scalar_lea.sflag [#allocation7], %s193_s29 }
  0x1c   : > { %p2686_p8 = pneg %p2278_p6  ;;  %s1930_s30 = scalar_lea.vmem %s208_s10, 8192 }
  0x1d   : > { %p1931_p9 = scmp.ne.s32.totalorder %s208_s10, %s1930_s30  ;;  %s2151_s4 = smov [#allocation6]  }
  0x1f   : > { %s206_s8 = scalar_lea.hbm %s2703_s1, %s1627_s5  ;;  %p1933_p10 = pnand %p1931_p9, %p2686_p8 }
  0x20   : > { %s1935_s5 = sshll.u32 %s2151_s4, 4  ;;  %s1936_s5 = int_to_ptr.vmem [resolvable:$false] %s1935_s5 }
  0x21   : > { %p1934_p11 = pneg %p1933_p10  ;;  %s1937_s6 = scalar_lea.vmem %s1936_s5, 16384 }
  0x22   : > { %p1938_p12 = scmp.lt.s32.totalorder %s208_s10, %s1936_s5  ;;  %p1939_p13 = scmp.lt.s32.totalorder %s1937_s6, %s1930_s30 }
  0x24   : > { %p1940_p2 = por %p1939_p13, %p1938_p12 }
  0x26   : > { %p1941_p5 = pnand %p1940_p2, %p1934_p11 }
  0x28   : > { %1944 = shalt.err (!%p1941_p5)
}
  0x29   : > { %s2682_s7 = smov 256   ;;  %s2153_s29 = smov 128  }
  0x2a   : > { %s2154_s30 = smov 8   ;;  %p234_p9 = scmp.lt.s32.totalorder %s2149_s25, 5 }
  0x2b   : > { %1644 = dma.hbm_to_vmem [thread:$0]  (!%p2278_p6), %s206_s8, 8192, %s208_s10, %s2283_s28, %s2682_s7, %s2153_s29, %s2154_s30  }
  0x2c   : > { %p2297_p10 = pnand %p1517_p7, %p234_p9  ;;  %s2302_s4 = sadd.s32 4294967295, %s2149_s25  }
  0x2d   : > { %s1504_s5 = sadd.s32 4294967294, %s2149_s25   ;;  %s2747_s26 = smov (%p2256_p1, %s37_s26), 0 }
  0x2e   : > { %2706 = sst [smem:[#allocation20_spill]] %s2747_s26  ;;  %s41_s6 = sadd.s32 1, %s2145_s24 }
  0x2f   : > { %s50_s8 = sadd.s32 1, %s2129_s20  ;;  %s2749_s6 = smov (!%p2256_p1, %s41_s6), %s2145_s24 }
  0x30   : > { %p57_p7 = scmp.ne.s32.totalorder %s2129_s20, %s2125_s19  ;;  %p63_p11 = scmp.ne.s32.totalorder %s2125_s19, %s2121_s18 }
  0x31   : > { %p43_p12 = scmp.ge.s32.totalorder %s2749_s6, 2  ;;  %p64_p13 = scmp.eq.s32.totalorder %s2302_s4, 0 }
  0x32   : > { %p2323_p2 = por %p58_p0, %p57_p7  ;;  %s74_s29 = ssub.s32 %s2141_s23, %s2747_s26 }
  0x33   : > { %s2751_s6 = smov (%p43_p12, %s2749_s6), 0  ;;  %p2331_p1 = por %p64_p13, %p63_p11 }
  0x34   : > { %2708 = sst [smem:[#allocation21_spill]] %s2751_s6  ;;  %p76_p5 = scmp.eq.s32.totalorder %s74_s29, 0 }
  0x35   : > { %s45_s18 = ssub.s32 %s2145_s24, %s2751_s6  ;;  %p2340_p9 = por %p91_p3, %p64_p13 }
  0x36   : > { %p48_p0 = scmp.eq.s32.totalorder %s45_s18, 0  ;;  %s129_s7 = sor.u32 %s74_s29, %s45_s18 }
  0x37   : > { %s2711_s1 = sadd.s32 1, %s2117_s17  ;;  %p130_p7 = scmp.eq.s32.totalorder %s129_s7, 0 }
  0x38   : > { %s2347_s26 = scalar_select %p76_p5, %s2117_s17, %s2711_s1  }
  0x39   : > { %s2350_s3 = scalar_select %p48_p0, %s2129_s20, %s50_s8  }
  0x3a   : > { %2712 = sst [smem:[#allocation22_spill]] %s2347_s26  ;;  %s132_s22 = sadd.s32 1, %s2105_s14 }
  0x3b   : > { %2713 = sst [smem:[#allocation23_spill]] %s2350_s3  ;;  %p142_p11 = scmp.ne.s32.totalorder %s2105_s14, %s2101_s13 }
  0x3c   : > { %p143_p12 = scmp.eq.s32.totalorder %s2302_s4, 3  ;;  %p148_p13 = scmp.ne.s32.totalorder %s2101_s13, %s2097_s12 }
  0x3d   : > { %s2357_s15 = scalar_select %p130_p7, %s2105_s14, %s132_s22  }
  0x3e   : > { %p2359_p3 = por %p143_p12, %p142_p11  ;;  %p149_p8 = scmp.eq.s32.totalorder %s1504_s5, 3 }
  0x3f   : > { %2714 = sst [smem:[#allocation24_spill]] %s2357_s15  ;;  %s169_s1 = sand.u32 1, %s2129_s20  }
  0x40   : > { %s1507_s29 = sshll.u32 %s169_s1, 8  ;;  %p2366_p5 = por %p149_p8, %p148_p13 }
  0x41   : > { %s1626_s7 = sshll.u32 %s2145_s24, 12  ;;  %s173_s18 = scalar_lea.vmem [#allocation3], %s1507_s29 }
  0x42   : > { %s2716_s8 = scalar_select %p2366_p5, 1, 0 }
  0x43   : > { %s183_s3 = sshll.u32 %s173_s18, 4  ;;  %s2717_s0 = sld [smem:[#allocation25_spill]]  ;;  %s184_s3 = int_to_ptr.vmem [resolvable:$true] %s183_s3 }
  0x44   : > { %p2378_p0 = pnand %p1652_p4, %p2323_p2  ;;  %s2719_s5 = sand.u32 1, %s2117_s17  }
  0x45   : > { %s1514_s20 = sshll.u32 %s2719_s5, 1  ;;  %s1628_s14 = sshll.u32 %s2141_s23, 5 }
  0x46   : > { %s170_s12 = scalar_lea.sflag [#allocation4], %s169_s1  ;;  %p1947_p8 = pneg %p2378_p0 }
  0x47   : > { %s1958_s29 = scalar_lea.vmem %s184_s3, 4096  ;;  %s2155_s21 = smov [#allocation3]  }
  0x48   : > { %p1959_p7 = scmp.ne.s32.totalorder %s184_s3, %s1958_s29  ;;  %s1963_s26 = sshll.u32 %s2155_s21, 4  ;;  %s1964_s26 = int_to_ptr.vmem [resolvable:$false] %s1963_s26 }
  0x49   : > { %s182_s22 = scalar_lea.hbm %s2717_s0, %s1626_s7  ;;  %s1965_s10 = scalar_lea.vmem %s1964_s26, 8192 }
  0x4a   : > { %p1961_p11 = pnand %p1959_p7, %p1947_p8  ;;  %p1966_p13 = scmp.lt.s32.totalorder %s184_s3, %s1964_s26 }
  0x4b   : > { %p1967_p4 = scmp.lt.s32.totalorder %s1965_s10, %s1958_s29 }
  0x4c   : > { %p1962_p12 = pneg %p1961_p11 }
  0x4d   : > { %p1968_p2 = por %p1967_p4, %p1966_p13 }
  0x4f   : > { %p1969_p5 = pnand %p1968_p2, %p1962_p12 }
  0x51   : > { %1972 = shalt.err (!%p1969_p5)
}
  0x52   : > { %s2156_s7 = smov 16   ;;  %s2720_s18 = smov 256  }
  0x53   : > { %1641 = dma.hbm_to_vmem [thread:$0]  (!%p2378_p0), %s182_s22, 4096, %s184_s3, %s170_s12, %s2720_s18, %s2720_s18, %s2156_s7  }
  0x54   : > { %s227_s0 = scalar_lea.hbm %s2679_s2, %s1628_s14  ;;  %s221_s24 = scalar_lea.vmem [#allocation8], %s1514_s20 }
  0x55   : > { %s229_s21 = sshll.u32 %s221_s24, 4  ;;  %p2721_p7 = pneg %p2278_p6  ;;  %s230_s21 = int_to_ptr.vmem [resolvable:$true] %s229_s21 }
  0x56   : > { %s1986_s23 = scalar_lea.vmem %s230_s21, 32  ;;  %s2157_s29 = smov [#allocation8]  }
  0x57   : > { %p1987_p8 = scmp.ne.s32.totalorder %s230_s21, %s1986_s23  ;;  %s1991_s26 = sshll.u32 %s2157_s29, 4  ;;  %s1992_s26 = int_to_ptr.vmem [resolvable:$false] %s1991_s26 }
  0x58   : > { %s1993_s15 = scalar_lea.vmem %s1992_s26, 64  ;;  %p1994_p12 = scmp.lt.s32.totalorder %s230_s21, %s1992_s26 }
  0x59   : > { %p1989_p11 = pnand %p1987_p8, %p2721_p7  ;;  %p1995_p13 = scmp.lt.s32.totalorder %s1993_s15, %s1986_s23 }
  0x5b   : > { %p1990_p5 = pneg %p1989_p11  ;;  %p1996_p0 = por %p1995_p13, %p1994_p12 }
  0x5d   : > { %p1997_p4 = pnand %p1996_p0, %p1990_p5 }
  0x5f   : > { %2000 = shalt.err (!%p1997_p4)
}
  0x60   : > { %1647 = dma.hbm_to_vmem [thread:$0]  (!%p2278_p6), %s227_s0, 32, %s230_s21, %s2283_s28  }
  0x61   : > { %238 = sbr.rel (%p2297_p10) target bundleno = 447 (0x1bf), region = 32  ;;  %s240_s3 = sand.u32 (!%p2297_p10), 1, %s2125_s19  }
  0x62   : > { %s1518_s12 = sshll.u32 (!%p2297_p10), %s240_s3, 8  ;;  %s241_s14 = scalar_lea.sflag (!%p2297_p10), [#allocation4], %s240_s3 }
  0x63   : > { %s2403_s20 = scalar_lea.vmem (!%p2297_p10), [#allocation3], %s1518_s12 }
  0x66   : > { %2084 = dma.done.wait (%p2331_p1), %s241_s14, 4096  }
  0x67   : > { %2086 = vsyncadd (%p2331_p1), %s241_s14, 4294963200  ;;  %s249_s0 = sand.u32 1, %s2302_s4   ;;  %s251_s23 = sand.u32 1, %s2113_s16  }
  0x68   : > { %s1519_s24 = sshll.u32 %s251_s23, 9  ;;  %s250_s28 = scalar_lea.sflag [#allocation7], %s249_s0 }
  0x69   : > { %s2413_s11 = scalar_lea.vmem [#allocation6], %s1519_s24 }
  0x6a   : > { %2088 = dma.done.wait (%p2340_p9), %s250_s28, 8224  }
  0x6b   : > { %2090 = vsyncadd (%p2340_p9), %s250_s28, 4294959072  ;;  %v1773_v0 = vld [vmem:[%s2413_s11 + $0x74] ss:$8 sps:$4 sm:$0xff]   ;;  %v1777_v2 = vld [vmem:[%s2413_s11 + $0x70] ss:$8 sps:$4 sm:$0xff]   ;;  %s1520_s9 = sshll.u32 %s251_s23, 1 }
  0x6c   : > { %v1775_v1 = vld [vmem:[%s2413_s11 + $0x174] ss:$8 sps:$4 sm:$0xff]   ;;  %946 = vmatprep.subr.bf16.mxu0 %v1773_v0  ;;  %v1778_v3 = vld [vmem:[%s2413_s11 + $0x170] ss:$8 sps:$4 sm:$0xff]   ;;  %v1779_v4 = vld [vmem:[%s2413_s11 + $0x64] ss:$8 sps:$4 sm:$0xff]  }
  0x6d   : > { %1059 = vmatprep.subr.bf16.mxu1 %v1775_v1  ;;  %947 = vmatpush1.bf16.msra.mxu0 %v1777_v2  ;;  %v1781_v5 = vld [vmem:[%s2413_s11 + $0x164] ss:$8 sps:$4 sm:$0xff]   ;;  %v1783_v6 = vld [vmem:[%s2413_s11 + $0x60] ss:$8 sps:$4 sm:$0xff]   ;;  %v1785_v8 = vld [vmem:[%s2413_s11 + $0x54] ss:$8 sps:$4 sm:$0xff]  }
  0x6e   : > { %1060 = vmatpush1.bf16.msra.mxu1 %v1778_v3  ;;  %948 = vmatprep.subr.bf16.mxu0 %v1779_v4  ;;  %v1784_v7 = vld [vmem:[%s2413_s11 + $0x160] ss:$8 sps:$4 sm:$0xff]   ;;  %v1787_v9 = vld [vmem:[%s2413_s11 + $0x154] ss:$8 sps:$4 sm:$0xff]   ;;  %v1789_v10 = vld [vmem:[%s2413_s11 + $0x50] ss:$8 sps:$4 sm:$0xff]  }
  0x6f   : > { %1061 = vmatprep.subr.bf16.mxu1 %v1781_v5  ;;  %v1790_v11 = vld [vmem:[%s2413_s11 + $0x150] ss:$8 sps:$4 sm:$0xff]   ;;  %v1791_v12 = vld [vmem:[%s2413_s11 + $0x44] ss:$8 sps:$4 sm:$0xff]   ;;  %v1795_v14 = vld [vmem:[%s2413_s11 + $0x40] ss:$8 sps:$4 sm:$0xff]  }
  0x70   : > { %v1793_v13 = vld [vmem:[%s2413_s11 + $0x144] ss:$8 sps:$4 sm:$0xff]   ;;  %v1796_v15 = vld [vmem:[%s2413_s11 + $0x140] ss:$8 sps:$4 sm:$0xff]   ;;  %v1797_v16 = vld [vmem:[%s2413_s11 + $0x34] ss:$8 sps:$4 sm:$0xff]  }
  0x71   : > { %949 = vmatpush1.bf16.msra.mxu0 %v1783_v6  ;;  %v1799_v17 = vld [vmem:[%s2413_s11 + $0x134] ss:$8 sps:$4 sm:$0xff]   ;;  %v1801_v18 = vld [vmem:[%s2413_s11 + $0x30] ss:$8 sps:$4 sm:$0xff]   ;;  %v1803_v20 = vld [vmem:[%s2413_s11 + $0x24] ss:$8 sps:$4 sm:$0xff]  }
  0x72   : > { %1062 = vmatpush1.bf16.msra.mxu1 %v1784_v7  ;;  %950 = vmatprep.subr.bf16.mxu0 %v1785_v8  ;;  %v1802_v19 = vld [vmem:[%s2413_s11 + $0x130] ss:$8 sps:$4 sm:$0xff]   ;;  %v1805_v21 = vld [vmem:[%s2413_s11 + $0x124] ss:$8 sps:$4 sm:$0xff]   ;;  %v1807_v22 = vld [vmem:[%s2413_s11 + $0x20] ss:$8 sps:$4 sm:$0xff]  }
  0x73   : > { %1063 = vmatprep.subr.bf16.mxu1 %v1787_v9  ;;  %v1808_v23 = vld [vmem:[%s2413_s11 + $0x120] ss:$8 sps:$4 sm:$0xff]   ;;  %v1809_v24 = vld [vmem:[%s2413_s11 + $0x14] ss:$8 sps:$4 sm:$0xff]   ;;  %v1813_v26 = vld [vmem:[%s2413_s11 + $0x10] ss:$8 sps:$4 sm:$0xff]  }
  0x74   : > { %v1811_v25 = vld [vmem:[%s2413_s11 + $0x114] ss:$8 sps:$4 sm:$0xff]   ;;  %v1814_v27 = vld [vmem:[%s2413_s11 + $0x110] ss:$8 sps:$4 sm:$0xff]   ;;  %v1815_v28 = vld [vmem:[%s2413_s11 + $0x4] ss:$8 sps:$4 sm:$0xff]  }
  0x75   : > { %951 = vmatpush1.bf16.msra.mxu0 %v1789_v10  ;;  %v1817_v29 = vld [vmem:[%s2413_s11 + $0x104] ss:$8 sps:$4 sm:$0xff]   ;;  %v1819_v30 = vld [vmem:[%s2413_s11] ss:$8 sps:$4 sm:$0xff]   ;;  %v1821_v32 = vld [vmem:[%s2413_s11 + $0xf4] ss:$8 sps:$4 sm:$0xff]  }
  0x76   : > { %1064 = vmatpush1.bf16.msra.mxu1 %v1790_v11  ;;  %952 = vmatprep.subr.bf16.mxu0 %v1791_v12  ;;  %v1820_v31 = vld [vmem:[%s2413_s11 + $0x100] ss:$8 sps:$4 sm:$0xff]   ;;  %v1823_v33 = vld [vmem:[%s2413_s11 + $0x1f4] ss:$8 sps:$4 sm:$0xff]   ;;  %v1825_v34 = vld [vmem:[%s2413_s11 + $0xf0] ss:$8 sps:$4 sm:$0xff]  }
  0x77   : > { %1065 = vmatprep.subr.bf16.mxu1 %v1793_v13  ;;  %v1826_v35 = vld [vmem:[%s2413_s11 + $0x1f0] ss:$8 sps:$4 sm:$0xff]   ;;  %v1827_v36 = vld [vmem:[%s2413_s11 + $0xe4] ss:$8 sps:$4 sm:$0xff]   ;;  %v1831_v38 = vld [vmem:[%s2413_s11 + $0xe0] ss:$8 sps:$4 sm:$0xff]  }
  0x78   : > { %v1829_v37 = vld [vmem:[%s2413_s11 + $0x1e4] ss:$8 sps:$4 sm:$0xff]   ;;  %v1832_v39 = vld [vmem:[%s2413_s11 + $0x1e0] ss:$8 sps:$4 sm:$0xff]   ;;  %v1833_v40 = vld [vmem:[%s2413_s11 + $0xd4] ss:$8 sps:$4 sm:$0xff]  }
  0x79   : > { %953 = vmatpush1.bf16.msra.mxu0 %v1795_v14  ;;  %v1835_v41 = vld [vmem:[%s2413_s11 + $0x1d4] ss:$8 sps:$4 sm:$0xff]   ;;  %v1837_v42 = vld [vmem:[%s2413_s11 + $0xd0] ss:$8 sps:$4 sm:$0xff]   ;;  %v1839_v44 = vld [vmem:[%s2413_s11 + $0xc4] ss:$8 sps:$4 sm:$0xff]  }
  0x7a   : > { %1066 = vmatpush1.bf16.msra.mxu1 %v1796_v15  ;;  %954 = vmatprep.subr.bf16.mxu0 %v1797_v16  ;;  %v1838_v43 = vld [vmem:[%s2413_s11 + $0x1d0] ss:$8 sps:$4 sm:$0xff]   ;;  %v1841_v45 = vld [vmem:[%s2413_s11 + $0x1c4] ss:$8 sps:$4 sm:$0xff]   ;;  %v1843_v46 = vld [vmem:[%s2413_s11 + $0xc0] ss:$8 sps:$4 sm:$0xff]  }
  0x7b   : > { %1067 = vmatprep.subr.bf16.mxu1 %v1799_v17  ;;  %v1844_v47 = vld [vmem:[%s2413_s11 + $0x1c0] ss:$8 sps:$4 sm:$0xff]   ;;  %v1845_v48 = vld [vmem:[%s2413_s11 + $0xb4] ss:$8 sps:$4 sm:$0xff]   ;;  %v1849_v52 = vld [vmem:[%s2413_s11 + $0xb0] ss:$8 sps:$4 sm:$0xff]  }
  0x7c   : > { %v1871_v49 = vld [vmem:[%s2403_s20 + $0x4] ss:$16 sps:$4 sm:$0xff]   ;;  %v1874_v51 = vld [vmem:[%s2403_s20 + $0xc] ss:$16 sps:$4 sm:$0xff]   ;;  %v1850_v53 = vld [vmem:[%s2413_s11 + $0x1b0] ss:$8 sps:$4 sm:$0xff]  }
  0x7d   : > { %955 = vmatpush1.bf16.msra.mxu0 %v1801_v18  ;;  %v1847_v50 = vld [vmem:[%s2413_s11 + $0x1b4] ss:$8 sps:$4 sm:$0xff]   ;;  %978 = vmatprep.mubr.bf16.mxu0 %v1871_v49  ;;  %v1851_v54 = vld [vmem:[%s2413_s11 + $0xa4] ss:$8 sps:$4 sm:$0xff]   ;;  %v1855_v56 = vld [vmem:[%s2413_s11 + $0xa0] ss:$8 sps:$4 sm:$0xff]  }
  0x7e   : > { %1068 = vmatpush1.bf16.msra.mxu1 %v1802_v19  ;;  %956 = vmatprep.subr.bf16.mxu0 %v1803_v20  ;;  %v1853_v55 = vld [vmem:[%s2413_s11 + $0x1a4] ss:$8 sps:$4 sm:$0xff]   ;;  %v1856_v57 = vld [vmem:[%s2413_s11 + $0x1a0] ss:$8 sps:$4 sm:$0xff]   ;;  %v1857_v58 = vld [vmem:[%s2413_s11 + $0x94] ss:$8 sps:$4 sm:$0xff]  }
  0x7f   : > { %1069 = vmatprep.subr.bf16.mxu1 %v1805_v21  ;;  %1091 = vmatprep.mubr.bf16.mxu1 %v1874_v51  ;;  %v1859_v59 = vld [vmem:[%s2413_s11 + $0x194] ss:$8 sps:$4 sm:$0xff]   ;;  %v1861_v60 = vld [vmem:[%s2413_s11 + $0x90] ss:$8 sps:$4 sm:$0xff]   ;;  %v1863_v62 = vld [vmem:[%s2413_s11 + $0x84] ss:$8 sps:$4 sm:$0xff]  }
  0x80   : > { %v1862_v61 = vld [vmem:[%s2413_s11 + $0x190] ss:$8 sps:$4 sm:$0xff]   ;;  %v1865_v63 = vld [vmem:[%s2413_s11 + $0x184] ss:$8 sps:$4 sm:$0xff]   ;;  %v1867_v0 = vld [vmem:[%s2413_s11 + $0x80] ss:$8 sps:$4 sm:$0xff]  }
  0x81   : > { %957 = vmatpush1.bf16.msra.mxu0 %v1807_v22  ;;  %v1868_v1 = vld [vmem:[%s2413_s11 + $0x180] ss:$8 sps:$4 sm:$0xff]   ;;  %v1875_v4 = vld [vmem:[%s2403_s20 + $0x24] ss:$16 sps:$4 sm:$0xff]   ;;  %v1877_v5 = vld [vmem:[%s2403_s20 + $0x2c] ss:$16 sps:$4 sm:$0xff]  }
  0x82   : > { %1070 = vmatpush1.bf16.msra.mxu1 %v1808_v23  ;;  %958 = vmatprep.subr.bf16.mxu0 %v1809_v24  ;;  %v1869_v2 = vld [vmem:[%s2403_s20] ss:$16 sps:$4 sm:$0xff]   ;;  %v1872_v3 = vld [vmem:[%s2403_s20 + $0x8] ss:$16 sps:$4 sm:$0xff]   ;;  %v1881_v8 = vld [vmem:[%s2403_s20 + $0x44] ss:$16 sps:$4 sm:$0xff]  }
  0x83   : > { %1071 = vmatprep.subr.bf16.mxu1 %v1811_v25  ;;  %v1879_v6 = vld [vmem:[%s2403_s20 + $0x20] ss:$16 sps:$4 sm:$0xff]   ;;  %v1880_v7 = vld [vmem:[%s2403_s20 + $0x28] ss:$16 sps:$4 sm:$0xff]   ;;  %v1883_v9 = vld [vmem:[%s2403_s20 + $0x4c] ss:$16 sps:$4 sm:$0xff]  }
  0x84   : > { %v1885_v10 = vld [vmem:[%s2403_s20 + $0x40] ss:$16 sps:$4 sm:$0xff]   ;;  %v1886_v11 = vld [vmem:[%s2403_s20 + $0x48] ss:$16 sps:$4 sm:$0xff]   ;;  %v1887_v12 = vld [vmem:[%s2403_s20 + $0x64] ss:$16 sps:$4 sm:$0xff]  }
  0x85   : > { %959 = vmatpush1.bf16.msra.mxu0 %v1813_v26  ;;  %v1889_v13 = vld [vmem:[%s2403_s20 + $0x6c] ss:$16 sps:$4 sm:$0xff]   ;;  %v1891_v14 = vld [vmem:[%s2403_s20 + $0x60] ss:$16 sps:$4 sm:$0xff]   ;;  %v1892_v15 = vld [vmem:[%s2403_s20 + $0x68] ss:$16 sps:$4 sm:$0xff]  }
  0x86   : > { %1072 = vmatpush1.bf16.msra.mxu1 %v1814_v27  ;;  %960 = vmatprep.subr.bf16.mxu0 %v1815_v28  ;;  %v1893_v16 = vld [vmem:[%s2403_s20 + $0x84] ss:$16 sps:$4 sm:$0xff]   ;;  %v1895_v17 = vld [vmem:[%s2403_s20 + $0x8c] ss:$16 sps:$4 sm:$0xff]   ;;  %v1897_v18 = vld [vmem:[%s2403_s20 + $0x80] ss:$16 sps:$4 sm:$0xff]  }
  0x87   : > { %1073 = vmatprep.subr.bf16.mxu1 %v1817_v29  ;;  %v1898_v19 = vld [vmem:[%s2403_s20 + $0x88] ss:$16 sps:$4 sm:$0xff]   ;;  %v1899_v20 = vld [vmem:[%s2403_s20 + $0xa4] ss:$16 sps:$4 sm:$0xff]   ;;  %v1901_v21 = vld [vmem:[%s2403_s20 + $0xac] ss:$16 sps:$4 sm:$0xff]  }
  0x88   : > { %v1903_v22 = vld [vmem:[%s2403_s20 + $0xa0] ss:$16 sps:$4 sm:$0xff]   ;;  %v1904_v23 = vld [vmem:[%s2403_s20 + $0xa8] ss:$16 sps:$4 sm:$0xff]   ;;  %v1905_v24 = vld [vmem:[%s2403_s20 + $0xc4] ss:$16 sps:$4 sm:$0xff]  }
  0x89   : > { %961 = vmatpush1.bf16.msra.mxu0 %v1819_v30  ;;  %v1907_v25 = vld [vmem:[%s2403_s20 + $0xcc] ss:$16 sps:$4 sm:$0xff]   ;;  %v1909_v26 = vld [vmem:[%s2403_s20 + $0xc0] ss:$16 sps:$4 sm:$0xff]   ;;  %v1910_v27 = vld [vmem:[%s2403_s20 + $0xc8] ss:$16 sps:$4 sm:$0xff]  }
  0x8a   : > { %1074 = vmatpush1.bf16.msra.mxu1 %v1820_v31  ;;  %962 = vmatprep.subr.bf16.mxu0 %v1821_v32  ;;  %v1911_v28 = vld [vmem:[%s2403_s20 + $0xe4] ss:$16 sps:$4 sm:$0xff]   ;;  %v1913_v29 = vld [vmem:[%s2403_s20 + $0xec] ss:$16 sps:$4 sm:$0xff]   ;;  %v1915_v30 = vld [vmem:[%s2403_s20 + $0xe0] ss:$16 sps:$4 sm:$0xff]   ;;  %v1273_v32 = vlaneseq }
  0x8b   : > { %1075 = vmatprep.subr.bf16.mxu1 %v1823_v33  ;;  %v1916_v31 = vld [vmem:[%s2403_s20 + $0xe8] ss:$16 sps:$4 sm:$0xff]   ;;  %s292_s4 = sand.u32 1, %s2101_s13   ;;  %s262_s27 = scalar_lea.vmem [#allocation8], %s1520_s9 }
  0x8c   : > { %v1274_v33 = vshrl.u32 %v1273_v32, 7  ;;  %s1521_s30 = sshll.u32 %s292_s4, 8  ;;  %s2722_s10 = sld [smem:[#allocation16_spill]] }
  0x8d   : > { %963 = vmatpush2.bf16.msra.mxu0 %v1825_v34  ;;  %s2525_s22 = scalar_lea.vmem [#allocation9], %s1521_s30  ;;  %s2723_s7 = sld [smem:[#allocation17_spill]] }
  0x8e   : > { %1076 = vmatpush2.bf16.msra.mxu1 %v1826_v35  ;;  %964 = vmatprep.subr.bf16.mxu0 %v1827_v36  ;;  %v1275_v34 = vsub.s32 0, %v1274_v33  ;;  %v1271_v35 = vld [vmem:[%s262_s27] sm:$0x3]  ;;  %v1279_v36 = vsub.s32 1, %v1274_v33  ;;  %s1364_s29 = sshll.u32 %s2525_s22, 4  ;;  %s2724_s3 = sld [smem:[#allocation27_spill]]  ;;  %s2595_s29 = int_to_ptr.vmem [resolvable:$true] %s1364_s29 }
  0x8f   : > { %1077 = vmatprep.subr.bf16.mxu1 %v1829_v37  ;;  %s2602_s14 = scalar_lea.sflag [#allocation5], %s292_s4  ;;  %s2001_s20 = scalar_lea.vmem %s2595_s29, 4096 }
  0x90   : > { %v2520_v37 = vrot.slane %v1271_v35, %v1275_v34  ;;  %p2002_p6 = scmp.ne.s32.totalorder %s2595_s29, %s2001_s20  ;;  %s2158_s0 = smov [#allocation9]  }
  0x91   : > { %965 = vmatpush2.bf16.msra.mxu0 %v1831_v38  ;;  %s2005_s23 = sshll.u32 %s2158_s0, 4  ;;  %s2006_s23 = int_to_ptr.vmem [resolvable:$false] %s2005_s23 }
  0x92   : > { %1078 = vmatpush2.bf16.msra.mxu1 %v1832_v39  ;;  %966 = vmatprep.subr.bf16.mxu0 %v1833_v40  ;;  %s1620_s18 = sshll.u32 %s2722_s10, 1  ;;  %p2003_p10 = pnand %p2002_p6, %p2359_p3 }
  0x93   : > { %1079 = vmatprep.subr.bf16.mxu1 %v1835_v41  ;;  %v2522_v41 = vrot.slane %v1271_v35, %v1279_v36  ;;  %s1629_s1 = sshll.u32 %s2723_s7, 6  ;;  %s2007_s24 = scalar_lea.vmem %s2006_s23, 8192 }
  0x94   : > { %s1361_s5 = sadd.s32 %s1629_s1, %s1620_s18  ;;  %p2004_p1 = pneg %p2003_p10 }
  0x95   : > { %967 = vmatpush2.bf16.msra.mxu0 %v1837_v42  ;;  %s1622_s21 = sshll.u32 %s1361_s5, 7  ;;  %p2008_p9 = scmp.lt.s32.totalorder %s2595_s29, %s2006_s23 }
  0x96   : > { %1080 = vmatpush2.bf16.msra.mxu1 %v1838_v43  ;;  %968 = vmatprep.subr.bf16.mxu0 %v1839_v44  ;;  %s2593_s12 = scalar_lea.hbm %s2724_s3, %s1622_s21  ;;  %p2009_p2 = scmp.lt.s32.totalorder %s2007_s24, %s2001_s20 }
  0x97   : > { %1081 = vmatprep.subr.bf16.mxu1 %v1841_v45 }
  0x98   : > { %p2010_p8 = por %p2009_p2, %p2008_p9 }
  0x99   : > { %969 = vmatpush2.bf16.msra.mxu0 %v1843_v46 }
  0x9a   : > { %1082 = vmatpush2.bf16.msra.mxu1 %v1844_v47  ;;  %970 = vmatprep.subr.bf16.mxu0 %v1845_v48  ;;  %p2011_p7 = pnand %p2010_p8, %p2004_p1 }
  0x9b   : > { %1083 = vmatprep.subr.bf16.mxu1 %v1847_v50 }
  0x9d   : > { %971 = vmatpush2.bf16.msra.mxu0 %v1849_v52 }
  0x9e   : > { %1084 = vmatpush2.bf16.msra.mxu1 %v1850_v53  ;;  %972 = vmatprep.subr.bf16.mxu0 %v1851_v54 }
  0x9f   : > { %1085 = vmatprep.subr.bf16.mxu1 %v1853_v55 }
  0xa1   : > { %973 = vmatpush2.bf16.msra.mxu0 %v1855_v56 }
  0xa2   : > { %1086 = vmatpush2.bf16.msra.mxu1 %v1856_v57  ;;  %974 = vmatprep.subr.bf16.mxu0 %v1857_v58 }
  0xa3   : > { %1087 = vmatprep.subr.bf16.mxu1 %v1859_v59 }
  0xa5   : > { %975 = vmatpush2.bf16.msra.mxu0 %v1861_v60 }
  0xa6   : > { %1088 = vmatpush2.bf16.msra.mxu1 %v1862_v61  ;;  %976 = vmatprep.subr.bf16.mxu0 %v1863_v62 }
  0xa7   : > { %1089 = vmatprep.subr.bf16.mxu1 %v1865_v63 }
  0xa9   : > { %977 = vmatpush2.bf16.msra.mxu0 %v1867_v0 }
  0xaa   : > { %1090 = vmatpush2.bf16.msra.mxu1 %v1868_v1 }
  0xac   : > { %979 = vmatmul.mubr.bf16.vlgmr.msra.gmra.mxu0 %v1869_v2 }
  0xad   : > { %1092 = vmatmul.mubr.bf16.vlgmr.msra.gmra.mxu1 %v1872_v3  ;;  %988 = vmatprep.mubr.bf16.mxu0 %v1875_v4 }
  0xae   : > { %1101 = vmatprep.mubr.bf16.mxu1 %v1877_v5 }
  0xb4   : > { %989 = vmatmul.mubr.bf16.gmra.mxu0 %v1879_v6 }
  0xb5   : > { %1102 = vmatmul.mubr.bf16.gmra.mxu1 %v1880_v7  ;;  %998 = vmatprep.mubr.bf16.mxu0 %v1881_v8 }
  0xb6   : > { %1111 = vmatprep.mubr.bf16.mxu1 %v1883_v9 }
  0xbc   : > { %999 = vmatmul.mubr.bf16.gmra.mxu0 %v1885_v10 }
  0xbd   : > { %1112 = vmatmul.mubr.bf16.gmra.mxu1 %v1886_v11  ;;  %1008 = vmatprep.mubr.bf16.mxu0 %v1887_v12 }
  0xbe   : > { %1121 = vmatprep.mubr.bf16.mxu1 %v1889_v13 }
  0xc4   : > { %1009 = vmatmul.mubr.bf16.gmra.mxu0 %v1891_v14 }
  0xc5   : > { %1122 = vmatmul.mubr.bf16.gmra.mxu1 %v1892_v15  ;;  %1018 = vmatprep.mubr.bf16.mxu0 %v1893_v16 }
  0xc6   : > { %1131 = vmatprep.mubr.bf16.mxu1 %v1895_v17 }
  0xcc   : > { %1019 = vmatmul.mubr.bf16.gmra.mxu0 %v1897_v18 }
  0xcd   : > { %1132 = vmatmul.mubr.bf16.gmra.mxu1 %v1898_v19  ;;  %1028 = vmatprep.mubr.bf16.mxu0 %v1899_v20 }
  0xce   : > { %1141 = vmatprep.mubr.bf16.mxu1 %v1901_v21 }
  0xd4   : > { %1029 = vmatmul.mubr.bf16.gmra.mxu0 %v1903_v22 }
  0xd5   : > { %1142 = vmatmul.mubr.bf16.gmra.mxu1 %v1904_v23  ;;  %1038 = vmatprep.mubr.bf16.mxu0 %v1905_v24 }
  0xd6   : > { %1151 = vmatprep.mubr.bf16.mxu1 %v1907_v25 }
  0xdc   : > { %1039 = vmatmul.mubr.bf16.gmra.mxu0 %v1909_v26 }
  0xdd   : > { %1152 = vmatmul.mubr.bf16.gmra.mxu1 %v1910_v27  ;;  %1048 = vmatprep.mubr.bf16.mxu0 %v1911_v28 }
  0xde   : > { %1161 = vmatprep.mubr.bf16.mxu1 %v1913_v29 }
  0xe4   : > { %1049 = vmatmul.mubr.bf16.gmra.mxu0 %v1915_v30 }
  0xe5   : > { %1162 = vmatmul.mubr.bf16.gmra.mxu1 %v1916_v31 }
 0x16c   : > { %v980_v38 = vpop.f32.mrf.mxu0 }
 0x16d   : > { %v1093_v39 = vpop.f32.mrf.mxu1 }
 0x16e   : > { %v1094_v40 = vadd.f32 %v1093_v39, %v980_v38  ;;  %v982_v42 = vpop.f32.mrf.mxu0 }
 0x16f   : > { %v1095_v43 = vpop.f32.mrf.mxu1 }
 0x170   : > { %v1283_v44 = vadd.f32 %v2520_v37, %v1094_v40  ;;  %v1096_v45 = vadd.f32 %v1095_v43, %v982_v42  ;;  %v984_v46 = vpop.f32.mrf.mxu0 }
 0x171   : > { %v1097_v47 = vpop.f32.mrf.mxu1 }
 0x172   : > { %1315 = vst [vmem:[%s2525_s22] sm:$0xff] %v1283_v44  ;;  %v1284_v48 = vadd.f32 %v2522_v41, %v1096_v45  ;;  %v1098_v49 = vadd.f32 %v1097_v47, %v984_v46  ;;  %v986_v50 = vpop.f32.mrf.mxu0 }
 0x173   : > { %v1099_v51 = vpop.f32.mrf.mxu1 }
 0x174   : > { %1316 = vst [vmem:[%s2525_s22 + $0x8] sm:$0xff] %v1284_v48  ;;  %v1285_v52 = vadd.f32 %v2520_v37, %v1098_v49  ;;  %v1100_v53 = vadd.f32 %v1099_v51, %v986_v50  ;;  %v990_v54 = vpop.f32.mrf.mxu0 }
 0x175   : > { %v1103_v55 = vpop.f32.mrf.mxu1 }
 0x176   : > { %1317 = vst [vmem:[%s2525_s22 + $0x10] sm:$0xff] %v1285_v52  ;;  %v1286_v56 = vadd.f32 %v2522_v41, %v1100_v53  ;;  %v1104_v57 = vadd.f32 %v1103_v55, %v990_v54  ;;  %v992_v58 = vpop.f32.mrf.mxu0 }
 0x177   : > { %v1105_v59 = vpop.f32.mrf.mxu1 }
 0x178   : > { %1318 = vst [vmem:[%s2525_s22 + $0x18] sm:$0xff] %v1286_v56  ;;  %v1287_v60 = vadd.f32 %v2520_v37, %v1104_v57  ;;  %v1106_v61 = vadd.f32 %v1105_v59, %v992_v58  ;;  %v994_v62 = vpop.f32.mrf.mxu0 }
 0x179   : > { %v1107_v63 = vpop.f32.mrf.mxu1 }
 0x17a   : > { %1319 = vst [vmem:[%s2525_s22 + $0x20] sm:$0xff] %v1287_v60  ;;  %v1288_v0 = vadd.f32 %v2522_v41, %v1106_v61  ;;  %v1108_v1 = vadd.f32 %v1107_v63, %v994_v62  ;;  %v996_v2 = vpop.f32.mrf.mxu0 }
 0x17b   : > { %v1109_v3 = vpop.f32.mrf.mxu1 }
 0x17c   : > { %1320 = vst [vmem:[%s2525_s22 + $0x28] sm:$0xff] %v1288_v0  ;;  %v1289_v4 = vadd.f32 %v2520_v37, %v1108_v1  ;;  %v1110_v5 = vadd.f32 %v1109_v3, %v996_v2  ;;  %v1000_v6 = vpop.f32.mrf.mxu0 }
 0x17d   : > { %v1113_v7 = vpop.f32.mrf.mxu1 }
 0x17e   : > { %1321 = vst [vmem:[%s2525_s22 + $0x30] sm:$0xff] %v1289_v4  ;;  %v1290_v8 = vadd.f32 %v2522_v41, %v1110_v5  ;;  %v1114_v9 = vadd.f32 %v1113_v7, %v1000_v6  ;;  %v1002_v10 = vpop.f32.mrf.mxu0 }
 0x17f   : > { %v1115_v11 = vpop.f32.mrf.mxu1 }
 0x180   : > { %1322 = vst [vmem:[%s2525_s22 + $0x38] sm:$0xff] %v1290_v8  ;;  %v1291_v12 = vadd.f32 %v2520_v37, %v1114_v9  ;;  %v1116_v13 = vadd.f32 %v1115_v11, %v1002_v10  ;;  %v1004_v14 = vpop.f32.mrf.mxu0 }
 0x181   : > { %v1117_v15 = vpop.f32.mrf.mxu1 }
 0x182   : > { %1323 = vst [vmem:[%s2525_s22 + $0x40] sm:$0xff] %v1291_v12  ;;  %v1292_v16 = vadd.f32 %v2522_v41, %v1116_v13  ;;  %v1118_v17 = vadd.f32 %v1117_v15, %v1004_v14  ;;  %v1006_v18 = vpop.f32.mrf.mxu0 }
 0x183   : > { %v1119_v19 = vpop.f32.mrf.mxu1 }
 0x184   : > { %1324 = vst [vmem:[%s2525_s22 + $0x48] sm:$0xff] %v1292_v16  ;;  %v1293_v20 = vadd.f32 %v2520_v37, %v1118_v17  ;;  %v1120_v21 = vadd.f32 %v1119_v19, %v1006_v18  ;;  %v1010_v22 = vpop.f32.mrf.mxu0 }
 0x185   : > { %v1123_v23 = vpop.f32.mrf.mxu1 }
 0x186   : > { %1325 = vst [vmem:[%s2525_s22 + $0x50] sm:$0xff] %v1293_v20  ;;  %v1294_v24 = vadd.f32 %v2522_v41, %v1120_v21  ;;  %v1124_v25 = vadd.f32 %v1123_v23, %v1010_v22  ;;  %v1012_v26 = vpop.f32.mrf.mxu0 }
 0x187   : > { %v1125_v27 = vpop.f32.mrf.mxu1 }
 0x188   : > { %1326 = vst [vmem:[%s2525_s22 + $0x58] sm:$0xff] %v1294_v24  ;;  %v1295_v28 = vadd.f32 %v2520_v37, %v1124_v25  ;;  %v1126_v29 = vadd.f32 %v1125_v27, %v1012_v26  ;;  %v1014_v30 = vpop.f32.mrf.mxu0 }
 0x189   : > { %v1127_v31 = vpop.f32.mrf.mxu1 }
 0x18a   : > { %1327 = vst [vmem:[%s2525_s22 + $0x60] sm:$0xff] %v1295_v28  ;;  %v1296_v32 = vadd.f32 %v2522_v41, %v1126_v29  ;;  %v1128_v33 = vadd.f32 %v1127_v31, %v1014_v30  ;;  %v1016_v34 = vpop.f32.mrf.mxu0 }
 0x18b   : > { %v1129_v35 = vpop.f32.mrf.mxu1 }
 0x18c   : > { %1328 = vst [vmem:[%s2525_s22 + $0x68] sm:$0xff] %v1296_v32  ;;  %v1297_v36 = vadd.f32 %v2520_v37, %v1128_v33  ;;  %v1130_v38 = vadd.f32 %v1129_v35, %v1016_v34  ;;  %v1020_v39 = vpop.f32.mrf.mxu0 }
 0x18d   : > { %v1133_v40 = vpop.f32.mrf.mxu1 }
 0x18e   : > { %1329 = vst [vmem:[%s2525_s22 + $0x70] sm:$0xff] %v1297_v36  ;;  %v1298_v42 = vadd.f32 %v2522_v41, %v1130_v38  ;;  %v1134_v43 = vadd.f32 %v1133_v40, %v1020_v39  ;;  %v1022_v44 = vpop.f32.mrf.mxu0 }
 0x18f   : > { %v1135_v45 = vpop.f32.mrf.mxu1 }
 0x190   : > { %1330 = vst [vmem:[%s2525_s22 + $0x78] sm:$0xff] %v1298_v42  ;;  %v1299_v46 = vadd.f32 %v2520_v37, %v1134_v43  ;;  %v1136_v47 = vadd.f32 %v1135_v45, %v1022_v44  ;;  %v1024_v48 = vpop.f32.mrf.mxu0 }
 0x191   : > { %v1137_v49 = vpop.f32.mrf.mxu1 }
 0x192   : > { %1331 = vst [vmem:[%s2525_s22 + $0x80] sm:$0xff] %v1299_v46  ;;  %v1300_v50 = vadd.f32 %v2522_v41, %v1136_v47  ;;  %v1138_v51 = vadd.f32 %v1137_v49, %v1024_v48  ;;  %v1026_v52 = vpop.f32.mrf.mxu0 }
 0x193   : > { %v1139_v53 = vpop.f32.mrf.mxu1 }
 0x194   : > { %1332 = vst [vmem:[%s2525_s22 + $0x88] sm:$0xff] %v1300_v50  ;;  %v1301_v54 = vadd.f32 %v2520_v37, %v1138_v51  ;;  %v1140_v55 = vadd.f32 %v1139_v53, %v1026_v52  ;;  %v1030_v56 = vpop.f32.mrf.mxu0 }
 0x195   : > { %v1143_v57 = vpop.f32.mrf.mxu1 }
 0x196   : > { %1333 = vst [vmem:[%s2525_s22 + $0x90] sm:$0xff] %v1301_v54  ;;  %v1302_v58 = vadd.f32 %v2522_v41, %v1140_v55  ;;  %v1144_v59 = vadd.f32 %v1143_v57, %v1030_v56  ;;  %v1032_v60 = vpop.f32.mrf.mxu0 }
 0x197   : > { %v1145_v61 = vpop.f32.mrf.mxu1 }
 0x198   : > { %1334 = vst [vmem:[%s2525_s22 + $0x98] sm:$0xff] %v1302_v58  ;;  %v1303_v62 = vadd.f32 %v2520_v37, %v1144_v59  ;;  %v1146_v63 = vadd.f32 %v1145_v61, %v1032_v60  ;;  %v1034_v0 = vpop.f32.mrf.mxu0 }
 0x199   : > { %v1147_v1 = vpop.f32.mrf.mxu1 }
 0x19a   : > { %1335 = vst [vmem:[%s2525_s22 + $0xa0] sm:$0xff] %v1303_v62  ;;  %v1304_v2 = vadd.f32 %v2522_v41, %v1146_v63  ;;  %v1148_v3 = vadd.f32 %v1147_v1, %v1034_v0  ;;  %v1036_v4 = vpop.f32.mrf.mxu0 }
 0x19b   : > { %v1149_v5 = vpop.f32.mrf.mxu1 }
 0x19c   : > { %1336 = vst [vmem:[%s2525_s22 + $0xa8] sm:$0xff] %v1304_v2  ;;  %v1305_v6 = vadd.f32 %v2520_v37, %v1148_v3  ;;  %v1150_v7 = vadd.f32 %v1149_v5, %v1036_v4  ;;  %v1040_v8 = vpop.f32.mrf.mxu0 }
 0x19d   : > { %v1153_v9 = vpop.f32.mrf.mxu1 }
 0x19e   : > { %1337 = vst [vmem:[%s2525_s22 + $0xb0] sm:$0xff] %v1305_v6  ;;  %v1306_v10 = vadd.f32 %v2522_v41, %v1150_v7  ;;  %v1154_v11 = vadd.f32 %v1153_v9, %v1040_v8  ;;  %v1042_v12 = vpop.f32.mrf.mxu0 }
 0x19f   : > { %v1155_v13 = vpop.f32.mrf.mxu1 }
 0x1a0   : > { %1338 = vst [vmem:[%s2525_s22 + $0xb8] sm:$0xff] %v1306_v10  ;;  %v1307_v14 = vadd.f32 %v2520_v37, %v1154_v11  ;;  %v1156_v15 = vadd.f32 %v1155_v13, %v1042_v12  ;;  %v1044_v16 = vpop.f32.mrf.mxu0 }
 0x1a1   : > { %v1157_v17 = vpop.f32.mrf.mxu1 }
 0x1a2   : > { %1339 = vst [vmem:[%s2525_s22 + $0xc0] sm:$0xff] %v1307_v14  ;;  %v1308_v18 = vadd.f32 %v2522_v41, %v1156_v15  ;;  %v1158_v19 = vadd.f32 %v1157_v17, %v1044_v16  ;;  %v1046_v20 = vpop.f32.mrf.mxu0 }
 0x1a3   : > { %v1159_v21 = vpop.f32.mrf.mxu1 }
 0x1a4   : > { %1340 = vst [vmem:[%s2525_s22 + $0xc8] sm:$0xff] %v1308_v18  ;;  %v1309_v22 = vadd.f32 %v2520_v37, %v1158_v19  ;;  %v1160_v23 = vadd.f32 %v1159_v21, %v1046_v20  ;;  %v1050_v24 = vpop.f32.mrf.mxu0 }
 0x1a5   : > { %v1163_v25 = vpop.f32.mrf.mxu1 }
 0x1a6   : > { %1341 = vst [vmem:[%s2525_s22 + $0xd0] sm:$0xff] %v1309_v22  ;;  %v1310_v26 = vadd.f32 %v2522_v41, %v1160_v23  ;;  %v1164_v27 = vadd.f32 %v1163_v25, %v1050_v24  ;;  %v1052_v28 = vpop.f32.mrf.mxu0 }
 0x1a7   : > { %v1165_v29 = vpop.f32.mrf.mxu1 }
 0x1a8   : > { %1342 = vst [vmem:[%s2525_s22 + $0xd8] sm:$0xff] %v1310_v26  ;;  %v1311_v30 = vadd.f32 %v2520_v37, %v1164_v27  ;;  %v1166_v31 = vadd.f32 %v1165_v29, %v1052_v28  ;;  %v1054_v32 = vpop.f32.mrf.mxu0 }
 0x1a9   : > { %v1167_v33 = vpop.f32.mrf.mxu1 }
 0x1aa   : > { %1343 = vst [vmem:[%s2525_s22 + $0xe0] sm:$0xff] %v1311_v30  ;;  %v1312_v34 = vadd.f32 %v2522_v41, %v1166_v31  ;;  %v1168_v35 = vadd.f32 %v1167_v33, %v1054_v32  ;;  %v1056_v36 = vpop.f32.mrf.mxu0 }
 0x1ab   : > { %v1169_v38 = vpop.f32.mrf.mxu1 }
 0x1ac   : > { %1344 = vst [vmem:[%s2525_s22 + $0xe8] sm:$0xff] %v1312_v34  ;;  %v1313_v39 = vadd.f32 %v2520_v37, %v1168_v35  ;;  %v1170_v40 = vadd.f32 %v1169_v38, %v1056_v36 }
 0x1ae   : > { %1345 = vst [vmem:[%s2525_s22 + $0xf0] sm:$0xff] %v1313_v39  ;;  %v1314_v42 = vadd.f32 %v2522_v41, %v1170_v40 }
 0x1b0   : > { %1346 = vst [vmem:[%s2525_s22 + $0xf8] sm:$0xff] %v1314_v42 }
 0x1b1   : > { %2014 = shalt.err (!%p2011_p7)
}
 0x1b2   : > { %s2015_s28 = scalar_lea.hbm %s2593_s12, 4096  ;;  %s2019_s4 = scalar_lea.hbm %s2724_s3, 16384 }
 0x1b3   : > { %p2016_p11 = scmp.ne.s32.totalorder %s2593_s12, %s2015_s28  ;;  %p2020_p13 = scmp.lt.s32.totalorder %s2593_s12, %s2724_s3 }
 0x1b4   : > { %p2021_p0 = scmp.lt.s32.totalorder %s2019_s4, %s2015_s28 }
 0x1b5   : > { %p2017_p5 = pnand %p2016_p11, %p2359_p3 }
 0x1b6   : > { %p2022_p4 = por %p2021_p0, %p2020_p13 }
 0x1b7   : > { %p2018_p12 = pneg %p2017_p5 }
 0x1b9   : > { %p2023_p6 = pnand %p2022_p4, %p2018_p12 }
 0x1bb   : > { %2026 = shalt.err (!%p2023_p6)
}
 0x1bc   : > { %s2159_s22 = smov 256   ;;  %s2160_s10 = smov 512  }
 0x1bd   : > { %s2161_s7 = smov 16  }
 0x1be   : > { %1636 = dma.vmem_to_hbm [thread:$0]  (%p2359_p3), %s2595_s29, 4096, %s2593_s12, %s2602_s14, %s2159_s22, %s2160_s10, %s2161_s7  }
 0x1bf PF: > { %s2725_s18 = sld [smem:[#allocation13_spill]]  ;;  %p1653_p10 = scmp.ge.s32.totalorder %s2149_s25, 2 }
 0x1c0   : > { %p2726_p1 = scmp.ne.s32.totalorder %s2716_s8, 0 }
 0x1c2   : > { %p1649_p9 = pnand %p1653_p10, %p2726_p1 }
 0x1c4   : > { %p1650_p2 = pneg %p1649_p9 }
 0x1c5   : > { %s1379_s1 = sand.u32 1, %s2725_s18  }
 0x1c6   : > { %s1380_s5 = scalar_lea.sflag [#allocation5], %s1379_s1 }
 0x1c7   : > { %2092 = dma.done.wait (%p1650_p2), %s1380_s5, 4096  }
 0x1c8   : > { %2094 = vsyncadd (%p1650_p2), %s1380_s5, 4294963200  ;;  %s22_s25 = sadd.s32 1, %s2149_s25   ;;  %s2728_s6 = sld [smem:[#allocation14_spill]] }
 0x1c9   : > { %p2630_p8 = scmp.ge.s32.totalorder %s22_s25, 6   ;;  %s2729_s14 = sld [smem:[#allocation24_spill]] }
 0x1ca   : > { %s2730_s29 = sld [smem:[#allocation22_spill]]  ;;  %s2738_s12 = smov %s2101_s13 }
 0x1cb   : > { %s2731_s26 = sld [smem:[#allocation15_spill]]  ;;  %s2740_s15 = smov %s2113_s16 }
 0x1cc   : > { %s2732_s20 = sld [smem:[#allocation23_spill]]  ;;  %s2741_s16 = smov %s2117_s17 }
 0x1cd   : > { %s2733_s8 = sld [smem:[#allocation18_spill]]  ;;  %s2743_s18 = smov %s2125_s19 }
 0x1ce   : > { %s2734_s22 = sld [smem:[#allocation19_spill]]  ;;  %s2739_s13 = smov %s2728_s6 }
 0x1cf   : > { %s2735_s23 = sld [smem:[#allocation20_spill]]  ;;  %21 = sbr.rel (!%p2630_p8) target bundleno = 16 (0x10), region = 109 }
 0x1d0   : > { %s2736_s24 = sld [smem:[#allocation21_spill]]  ;;  %s2742_s17 = smov %s2730_s29 }
 0x1d1   : > { %s2744_s19 = smov %s2731_s26 }
 0x1d3   : > { %s2745_s21 = smov %s2733_s8 }
 0x1d4   :  { %1385 = vsyncpa [#allocation4], 1 }
 0x1d5   :  { %1387 = vsyncpa [#allocation4 + $0x1], 1 }
 0x1d6   :  { %1388 = vsyncpa [#allocation7], 1 }
 0x1d7   :  { %1390 = vsyncpa [#allocation7 + $0x1], 1 }
 0x1d8   :  { %1391 = vsyncpa [#allocation5], 1 }
 0x1d9   :  { %1393 = vsyncpa [#allocation5 + $0x1], 1 }

</bundles_post_ra>
